<compile_context>
chip_gen: v7x
topology: tpu7x:2x2x1
jax: 0.10.0
libtpu: 0.0.40
codegen_flags: <defaults>
</compile_context>

<pallas_src>
import jax
import jax.numpy as jnp
from jax.experimental import pallas as pl
from jax.experimental.pallas import tpu as pltpu

NP = 8           # padded output-feature rows (sublane multiple; real N = 3)
OUT_F = 3        # real output features
LANE = 128       # TPU lane width
TILE_MAX = 1024  # max batch-tile (lane) width per grid step


def _xy_kernel(xt_ref, yt_ref, w1_ref, w2_ref, b_ref, o_ref):
    """o^T = W1 @ x^T + W2 @ y^T + (b1+b2) on a (NP, TILE) lane-dense tile.

    xt: (2, T), yt: (1, T), w1: (NP, 2), w2: (NP, 1), b: (NP, 1) -> o: (NP, T).
    Three VPU broadcast mul-adds (lane-broadcast of the weight column,
    sublane-broadcast of the activation row); no MXU needed.
    """
    o_ref[...] = (
        b_ref[...]
        + w1_ref[:, 0:1] * xt_ref[0:1, :]
        + w1_ref[:, 1:2] * xt_ref[1:2, :]
        + w2_ref[:, 0:1] * yt_ref[0:1, :]
    )


def _x_kernel(xt_ref, w1_ref, b_ref, o_ref):
    """o^T = W1 @ x^T + b1  (y is None path)."""
    o_ref[...] = (
        b_ref[...]
        + w1_ref[:, 0:1] * xt_ref[0:1, :]
        + w1_ref[:, 1:2] * xt_ref[1:2, :]
    )


def _bucket(batch):
    """Bucket the padded batch to a power of two (>= 256) so only a handful of
    Pallas shapes are ever compiled; pick the tile so the 1-D 'parallel' grid
    always has >= 2 steps (keeps both v7x TensorCores busy) with tiles of
    128..1024 lanes."""
    bp = max(2 * LANE, pl.next_power_of_2(batch))
    tile = min(TILE_MAX, bp // 2)
    return bp, tile


def _call_xy(xt, yt, w1_p, w2_p, b_p, tile):
    bp = xt.shape[1]
    return pl.pallas_call(
        _xy_kernel,
        out_shape=jax.ShapeDtypeStruct((NP, bp), jnp.float32),
        grid=(bp // tile,),
        in_specs=[
            pl.BlockSpec((2, tile), lambda i: (0, i)),   # x^T: tiled over batch
            pl.BlockSpec((1, tile), lambda i: (0, i)),   # y^T: tiled over batch
            pl.BlockSpec((NP, 2), lambda i: (0, 0)),     # W1 (row-padded), constant
            pl.BlockSpec((NP, 1), lambda i: (0, 0)),     # W2 (row-padded), constant
            pl.BlockSpec((NP, 1), lambda i: (0, 0)),     # fused bias, constant
        ],
        out_specs=pl.BlockSpec((NP, tile), lambda i: (0, i)),
        compiler_params=pltpu.CompilerParams(
            dimension_semantics=("parallel",)),
    )(xt, yt, w1_p, w2_p, b_p)


def _call_x(xt, w1_p, b_p, tile):
    bp = xt.shape[1]
    return pl.pallas_call(
        _x_kernel,
        out_shape=jax.ShapeDtypeStruct((NP, bp), jnp.float32),
        grid=(bp // tile,),
        in_specs=[
            pl.BlockSpec((2, tile), lambda i: (0, i)),   # x^T: tiled over batch
            pl.BlockSpec((NP, 2), lambda i: (0, 0)),     # W1 (row-padded), constant
            pl.BlockSpec((NP, 1), lambda i: (0, 0)),     # bias, constant
        ],
        out_specs=pl.BlockSpec((NP, tile), lambda i: (0, i)),
        compiler_params=pltpu.CompilerParams(
            dimension_semantics=("parallel",)),
    )(xt, w1_p, b_p)


@jax.jit
def _forward_xy(x, y, w1_p, w2_p, b_p):
    batch = x.shape[0]
    bp, tile = _bucket(batch)
    pad = ((0, 0), (0, bp - batch))
    xt = jnp.pad(x.astype(jnp.float32).T, pad)        # (2, bp)
    yt = jnp.pad(y.astype(jnp.float32).T, pad)        # (1, bp)
    ot = _call_xy(xt, yt, w1_p, w2_p, b_p, tile)      # (NP, bp)
    return ot[:OUT_F, :batch].T                       # (batch, 3)


@jax.jit
def _forward_x(x, w1_p, b_p):
    batch = x.shape[0]
    bp, tile = _bucket(batch)
    xt = jnp.pad(x.astype(jnp.float32).T, ((0, 0), (0, bp - batch)))
    ot = _call_x(xt, w1_p, b_p, tile)
    return ot[:OUT_F, :batch].T


def _pad_rows(a, rows):
    return jnp.pad(a, ((0, rows - a.shape[0]), (0, 0)))


def prepare_params(params):
    """One-time parameter prep (hoisted out of forward): row-pad + fuse bias."""
    w1 = params["w1"].astype(jnp.float32)             # (3, 2)
    b1 = params["b1"].astype(jnp.float32)             # (3,)
    w2 = params["w2"].astype(jnp.float32)             # (3, 1)
    b2 = params["b2"].astype(jnp.float32)             # (3,)
    return {
        "w1_p": _pad_rows(w1, NP),                    # (8, 2)
        "w2_p": _pad_rows(w2, NP),                    # (8, 1)
        "b_x_p": _pad_rows(b1[:, None], NP),          # (8, 1)
        "b_xy_p": _pad_rows((b1 + b2)[:, None], NP),  # (8, 1)
    }


def testnet_forward(prepped, x, y=None):
    """Mirrors testnet.forward. x: (B, 2), y: (B, 1) or None -> (B, 3)."""
    if y is not None:
        return _forward_xy(x, y, prepped["w1_p"], prepped["w2_p"],
                           prepped["b_xy_p"])
    return _forward_x(x, prepped["w1_p"], prepped["b_x_p"])


def init_params(key):
    """Deterministic params matching nn.Linear(2,3) / nn.Linear(1,3) shapes."""
    k1, k2, k3, k4 = jax.random.split(key, 4)
    return {
        # PyTorch stores Linear weight as (out_features, in_features)
        "w1": jax.random.uniform(k1, (3, 2), jnp.float32, -0.5, 0.5),
        "b1": jax.random.uniform(k2, (3,), jnp.float32, -0.5, 0.5),
        "w2": jax.random.uniform(k3, (3, 1), jnp.float32, -0.5, 0.5),
        "b2": jax.random.uniform(k4, (3,), jnp.float32, -0.5, 0.5),
    }


if __name__ == "__main__":
    key = jax.random.PRNGKey(0)
    kp, kx, ky = jax.random.split(key, 3)
    params = init_params(kp)
    prepped = prepare_params(params)      # one-time, hoisted out of forward

    # Small batch (bucketed to 256 lanes, grid of 2 parallel steps)
    B = 4
    x = jax.random.normal(kx, (B, 2), jnp.float32)
    y = jax.random.normal(ky, (B, 1), jnp.float32)
    out_xy = jax.block_until_ready(testnet_forward(prepped, x, y))
    out_x = jax.block_until_ready(testnet_forward(prepped, x, None))

    # Non-multiple-of-tile batch (same 256-lane bucket -> shared compile)
    B2 = 20
    x2 = jax.random.normal(kx, (B2, 2), jnp.float32)
    y2 = jax.random.normal(ky, (B2, 1), jnp.float32)
    out_xy2 = jax.block_until_ready(testnet_forward(prepped, x2, y2))

    # Larger batch to exercise the wide-tile path (bucket 1024, tile 512)
    B3 = 600
    x3 = jax.random.normal(kx, (B3, 2), jnp.float32)
    y3 = jax.random.normal(ky, (B3, 1), jnp.float32)
    out_xy3 = jax.block_until_ready(testnet_forward(prepped, x3, y3))

    # Plain-JAX references
    def ref_fn(xx, yy=None):
        r = xx @ params["w1"].T + params["b1"]
        if yy is not None:
            r = r + yy @ params["w2"].T + params["b2"]
        return r

    assert out_xy.shape == (B, 3) and out_x.shape == (B, 3)
    assert out_xy2.shape == (B2, 3) and out_xy3.shape == (B3, 3)
    assert jnp.allclose(out_xy, ref_fn(x, y), atol=1e-5, rtol=1e-5)
    assert jnp.allclose(out_x, ref_fn(x), atol=1e-5, rtol=1e-5)
    assert jnp.allclose(out_xy2, ref_fn(x2, y2), atol=1e-5, rtol=1e-5)
    assert jnp.allclose(out_xy3, ref_fn(x3, y3), atol=1e-5, rtol=1e-5)

    print("KERNEL_OK")
</pallas_src>

<mosaic_0001>
module attributes {stable_mosaic.version = 11 : i64} {
  func.func @_xy_kernel(%arg0: i32, %arg1: memref<2x128xf32, #tpu.memory_space<vmem>>, %arg2: memref<1x128xf32, #tpu.memory_space<vmem>>, %arg3: memref<8x2xf32, #tpu.memory_space<vmem>>, %arg4: memref<8x1xf32, #tpu.memory_space<vmem>>, %arg5: memref<8x1xf32, #tpu.memory_space<vmem>>, %arg6: memref<8x128xf32, #tpu.memory_space<vmem>>) attributes {dimension_semantics = [#tpu.dimension_semantics<parallel>], iteration_bounds = array<i64: 2>, scalar_prefetch = 0 : i64, scratch_operands = 0 : i64, tpu.core_type = #tpu.core_type<tc>, window_params = [{transform_indices = @transform_0, window_bounds = array<i64: 2, 128>}, {transform_indices = @transform_1, window_bounds = array<i64: 1, 128>}, {pipeline_mode = #tpu.pipeline_mode<synchronous>, transform_indices = @transform_2, window_bounds = array<i64: 8, 2>}, {pipeline_mode = #tpu.pipeline_mode<synchronous>, transform_indices = @transform_3, window_bounds = array<i64: 8, 1>}, {pipeline_mode = #tpu.pipeline_mode<synchronous>, transform_indices = @transform_4, window_bounds = array<i64: 8, 1>}, {transform_indices = @transform_5, window_bounds = array<i64: 8, 128>}]} {
    %c0 = arith.constant 0 : index
    %c0_0 = arith.constant 0 : index
    %0 = vector.load %arg5[%c0, %c0_0] : memref<8x1xf32, #tpu.memory_space<vmem>>, vector<8x1xf32>
    %c0_1 = arith.constant 0 : index
    %c0_2 = arith.constant 0 : index
    %1 = vector.load %arg3[%c0_1, %c0_2] : memref<8x2xf32, #tpu.memory_space<vmem>>, vector<8x1xf32>
    %c0_3 = arith.constant 0 : index
    %c0_4 = arith.constant 0 : index
    %2 = vector.load %arg1[%c0_3, %c0_4] : memref<2x128xf32, #tpu.memory_space<vmem>>, vector<1x128xf32>
    %3 = vector.broadcast %1 : vector<8x1xf32> to vector<8x128xf32>
    %4 = vector.broadcast %2 : vector<1x128xf32> to vector<8x128xf32>
    %5 = arith.mulf %3, %4 : vector<8x128xf32>
    %6 = vector.broadcast %0 : vector<8x1xf32> to vector<8x128xf32>
    %7 = arith.addf %6, %5 : vector<8x128xf32>
    %c0_5 = arith.constant 0 : index
    %c1 = arith.constant 1 : index
    %8 = vector.load %arg3[%c0_5, %c1] : memref<8x2xf32, #tpu.memory_space<vmem>>, vector<8x1xf32>
    %c1_6 = arith.constant 1 : index
    %c0_7 = arith.constant 0 : index
    %9 = vector.load %arg1[%c1_6, %c0_7] : memref<2x128xf32, #tpu.memory_space<vmem>>, vector<1x128xf32>
    %10 = vector.broadcast %8 : vector<8x1xf32> to vector<8x128xf32>
    %11 = vector.broadcast %9 : vector<1x128xf32> to vector<8x128xf32>
    %12 = arith.mulf %10, %11 : vector<8x128xf32>
    %13 = arith.addf %7, %12 : vector<8x128xf32>
    %c0_8 = arith.constant 0 : index
    %c0_9 = arith.constant 0 : index
    %14 = vector.load %arg4[%c0_8, %c0_9] : memref<8x1xf32, #tpu.memory_space<vmem>>, vector<8x1xf32>
    %c0_10 = arith.constant 0 : index
    %c0_11 = arith.constant 0 : index
    %15 = vector.load %arg2[%c0_10, %c0_11] : memref<1x128xf32, #tpu.memory_space<vmem>>, vector<1x128xf32>
    %16 = vector.broadcast %14 : vector<8x1xf32> to vector<8x128xf32>
    %17 = vector.broadcast %15 : vector<1x128xf32> to vector<8x128xf32>
    %18 = arith.mulf %16, %17 : vector<8x128xf32>
    %19 = arith.addf %13, %18 : vector<8x128xf32>
    %c0_12 = arith.constant 0 : index
    %c0_13 = arith.constant 0 : index
    %20 = vector.load %arg6[%c0_12, %c0_13] : memref<8x128xf32, #tpu.memory_space<vmem>>, vector<8x128xf32>
    tpu.vector_store %arg6[%c0_12, %c0_13], %19 {strides = array<i32>} : memref<8x128xf32, #tpu.memory_space<vmem>>, vector<8x128xf32>,
    return
  }
  func.func @transform_0(%arg0: i32) -> (i32, i32) {
    %c0_i32 = arith.constant 0 : i32
    %c0_i32_0 = arith.constant 0 : i32
    return %c0_i32, %arg0 : i32, i32
  }
  func.func @transform_1(%arg0: i32) -> (i32, i32) {
    %c0_i32 = arith.constant 0 : i32
    %c0_i32_0 = arith.constant 0 : i32
    return %c0_i32, %arg0 : i32, i32
  }
  func.func @transform_2(%arg0: i32) -> (i32, i32) {
    %c0_i32 = arith.constant 0 : i32
    %c0_i32_0 = arith.constant 0 : i32
    %c0_i32_1 = arith.constant 0 : i32
    return %c0_i32, %c0_i32_0 : i32, i32
  }
  func.func @transform_3(%arg0: i32) -> (i32, i32) {
    %c0_i32 = arith.constant 0 : i32
    %c0_i32_0 = arith.constant 0 : i32
    %c0_i32_1 = arith.constant 0 : i32
    return %c0_i32, %c0_i32_0 : i32, i32
  }
  func.func @transform_4(%arg0: i32) -> (i32, i32) {
    %c0_i32 = arith.constant 0 : i32
    %c0_i32_0 = arith.constant 0 : i32
    %c0_i32_1 = arith.constant 0 : i32
    return %c0_i32, %c0_i32_0 : i32, i32
  }
  func.func @transform_5(%arg0: i32) -> (i32, i32) {
    %c0_i32 = arith.constant 0 : i32
    %c0_i32_0 = arith.constant 0 : i32
    return %c0_i32, %arg0 : i32, i32
  }
}

</mosaic_0001>

<bundles_post_ra>
// kernel: _forward_xy.1
= control target key start
LH: loop header
LB: loop body
LE: loop exit
PB: predicated region body
PF: predicated region fallthrough
CT: control target
= control target key end

     0   :  { %s407_s18 = smov 0   ;;  %s436_s0 = inlined_call_operand.vmem [shape: f32[2,256], index: 0, kind: input, shape index: {}]   ;;  %s437_s1 = inlined_call_operand.vmem [shape: f32[1,256], index: 1, kind: input, shape index: {}]   ;;  %s438_s2 = inlined_call_operand.vmem [shape: f32[8,2], index: 2, kind: input, shape index: {}]   ;;  %s439_s3 = inlined_call_operand.vmem [shape: f32[8,1], index: 3, kind: input, shape index: {}]   ;;  %s440_s4 = inlined_call_operand.vmem [shape: f32[8,1], index: 4, kind: input, shape index: {}]   ;;  %s441_s5 = inlined_call_operand.vmem [shape: f32[8,256], index: 5, kind: output, shape index: {}]  }
   0x1 LB: > { %s342_s19 = sadd.s32 4294967295, %s373_s18   ;;  %p346_p0 = scmp.ge.s32.totalorder %s373_s18, 1  ;;  %s373_s18 = sphi %s407_s18, %s15_s18  }
   0x2   : > { %p194_p1 = scmp.lt.s32.totalorder %s373_s18, 3 }
   0x4   : > { %p195_p2 = pnand %p346_p0, %p194_p1 }
   0x5   : > { %v235_v0 = vld [vmem:[%s438_s2] sm:$0xff] (!%p195_p2)  ;;  %v375_v1 = vmov (!%p195_p2), 0   ;;  %v376_v2 = vmov (!%p195_p2), 1   ;;  %p223_p3 = scmp.lt.s32.totalorder (!%p195_p2), %s342_s19, 1 }
   0x6   : > { %198 = sbr.rel (%p195_p2) target bundleno = 146 (0x92), region = 40  ;;  %364 = vset.pattern.permute.xlu0 (!%p195_p2), %v375_v1  ;;  %365 = vset.pattern.permute.xlu1 (!%p195_p2), %v376_v2  ;;  %v234_v3 = vld [vmem:[%s440_s4] sm:$0xff] (!%p195_p2) }
   0x7   : > { %239 = vperm.xlu0 (!%p195_p2), %364, %v235_v0   ;;  %255 = vperm.xlu1 (!%p195_p2), %365, %v235_v0   ;;  %v264_v4 = vld [vmem:[%s439_s3] sm:$0xff] (!%p195_p2) }
   0xb   : > { %249 = vperm.xlu0 (!%p195_p2), %364, %v234_v3   ;;  %366 = vset.pattern.permute.xlu1 (!%p195_p2), %v375_v1 }
   0xc   : > { %268 = vperm.xlu1 (!%p195_p2), %366, %v264_v4  }
   0xd   : > { %s443_s19 = smov (!%p223_p3, %s342_s19), 1 }
   0xe   : > { %s347_s26 = sshll.u32 %s443_s19, 1  ;;  %s229_s7 = scalar_lea.vmem %s437_s1, %s443_s19 }
   0xf   : > { %s226_s29 = scalar_lea.vmem %s436_s0, %s347_s26  ;;  %v351_v10 = vld [vmem:[%s229_s7] ss:$0 sm:$0xff]  ;;  %s348_s8 = sshll.u32 %s443_s19, 3 }
  0x10   : > { %v349_v6 = vld [vmem:[%s226_s29] ss:$0 sm:$0xff]  ;;  %v350_v8 = vld [vmem:[%s226_s29 + $0x1] ss:$0 sm:$0xff]  ;;  %s233_s11 = scalar_lea.vmem %s441_s5, %s348_s8 }
  0x86   : > { %v240_v5 = vpop.permute.xlu0 %239  ;;  %v256_v7 = vpop.permute.xlu1 %255 }
  0x87   : > { %v246_v9 = vmul.f32 %v349_v6, %v240_v5  ;;  %v262_v12 = vmul.f32 %v350_v8, %v256_v7 }
  0x8a   : > { %v250_v11 = vpop.permute.xlu0 %249 }
  0x8b   : > { %v252_v13 = vadd.f32 %v250_v11, %v246_v9  ;;  %v269_v14 = vpop.permute.xlu1 %268 }
  0x8c   : > { %v277_v15 = vmul.f32 %v351_v10, %v269_v14 }
  0x8d   : > { %v263_v16 = vadd.f32 %v262_v12, %v252_v13 }
  0x8f   : > { %v278_v17 = vadd.f32 %v277_v15, %v263_v16 }
  0x91   : > { %279 = vst [vmem:[%s233_s11] sm:$0xff] %v278_v17 }
  0x92 PF: > { %s15_s18 = sadd.s32 1, %s373_s18  }
  0x93   : > { %p12_p4 = scmp.ge.s32.totalorder %s15_s18, 4  }
  0x95   :  { %14 = sbr.rel (!%p12_p4) target bundleno = 1 (0x1), region = 73 }

</bundles_post_ra>
